<compile_context>
chip_gen: v7x
topology: tpu7x:2x2x1
jax: 0.10.0
libtpu: 0.0.40
codegen_flags: <defaults>
</compile_context>

<pallas_src>
import functools

import jax
import jax.numpy as jnp
from jax import lax
from jax.experimental import pallas as pl
from jax.experimental.pallas import tpu as pltpu


DELTA_T = 0.1


# ----------------------------------------------------------------------------
# Kernel: one grid point == one independent M-tile of rows; the whole time
# integration runs as an in-kernel fori_loop with the state resident in o_ref.
# ----------------------------------------------------------------------------
def _fused_euler_kernel(t0_ref, x_ref, p_ref, w_ref, b_ref, o_ref, *,
                        delta_t, n_steps):
    tm = o_ref.shape[0]
    t0 = t0_ref[0, 0]

    # State lives in the output block (constant VMEM buffer for this grid
    # point); no scratch accumulator, no finalize copy.
    o_ref[...] = x_ref[...]

    split = (tm >= 16) and (tm % 16 == 0)
    half = tm // 2

    def _update(x_rows, c_rows):
        # bf16 MXU matmul with f32 accumulation; state update stays f32.
        k = jnp.tanh(
            jnp.dot(x_rows.astype(jnp.bfloat16), w_ref[...],
                    preferred_element_type=jnp.float32)
            + c_rows)
        return x_rows + delta_t * k

    def step(s, carry):
        # scalar path: t = t0 + s * delta_t
        t = t0 + delta_t * s.astype(jnp.float32)
        if split:
            # Two independent half-tiles: the second half's matmul (MXU) can
            # issue while the first half's tanh (EUP) / axpy (VPU) drain.
            xa = o_ref[pl.ds(0, half), :]
            xb = o_ref[pl.ds(half, half), :]
            ca = t * b_ref[pl.ds(0, half), :] + p_ref[pl.ds(0, half), :]
            cb = t * b_ref[pl.ds(half, half), :] + p_ref[pl.ds(half, half), :]
            o_ref[pl.ds(0, half), :] = _update(xa, ca)
            o_ref[pl.ds(half, half), :] = _update(xb, cb)
        else:
            x = o_ref[...]
            c = t * b_ref[...] + p_ref[...]
            o_ref[...] = _update(x, c)
        return carry

    lax.fori_loop(0, n_steps, step, 0, unroll=(n_steps <= 16))


def _euler_pallas(curr_t, x2d, p2d, w_bf16, b_tile, *, n_steps, delta_t, tm):
    """n_steps fused Euler steps on an (M, T) state; M tiled into tm-row tiles."""
    m, tsz = x2d.shape
    assert m % tm == 0 and b_tile.shape == (tm, tsz)
    t_arr = jnp.reshape(jnp.asarray(curr_t, jnp.float32), (1, 1))

    grid_spec = pltpu.PrefetchScalarGridSpec(
        num_scalar_prefetch=0,
        grid=(m // tm,),
        in_specs=[
            pl.BlockSpec(memory_space=pltpu.MemorySpace.SMEM),   # t0 (1,1) scalar
            pl.BlockSpec((tm, tsz), lambda i: (i, 0)),           # x  tile
            pl.BlockSpec((tm, tsz), lambda i: (i, 0)),           # p  tile
            pl.BlockSpec((tsz, tsz), lambda i: (0, 0)),          # W  (bf16, resident)
            pl.BlockSpec((tm, tsz), lambda i: (0, 0)),           # b  tile (resident)
        ],
        out_specs=pl.BlockSpec((tm, tsz), lambda i: (i, 0)),     # lane-dense output
    )

    return pl.pallas_call(
        functools.partial(_fused_euler_kernel, delta_t=float(delta_t),
                          n_steps=int(n_steps)),
        out_shape=jax.ShapeDtypeStruct((m, tsz), jnp.float32),
        grid_spec=grid_spec,
        compiler_params=pltpu.CompilerParams(
            # M-tiles are independent (time loop is inside the kernel) ->
            # shardable across TensorCores on v7x.
            dimension_semantics=("parallel",),
        ),
    )(t_arr, x2d, p2d, w_bf16, b_tile)


def _pick_tile(m, dim):
    for tm in (256, 128):
        if m > tm and m % tm == 0 and tm % dim == 0:
            return tm
    return m


# ----------------------------------------------------------------------------
# Public wrappers
# ----------------------------------------------------------------------------
def runge_kutta_forward(curr_t, curr_x, dyn_para, W, b, *, delta_t=DELTA_T):
    """Exact module forward: ONE explicit-Euler step on a (dim, T) state.

    NOTE: with M = dim (8) rows this path is launch/DMA dominated by
    construction; the perf-tuned path is `runge_kutta_integrate`.
    """
    dim, tsz = curr_x.shape
    return _euler_pallas(curr_t, curr_x, dyn_para, W.astype(jnp.bfloat16), b,
                         n_steps=1, delta_t=delta_t, tm=dim)


def runge_kutta_integrate(curr_t, curr_x, dyn_para, W, b, *, n_steps,
                          delta_t=DELTA_T):
    """n_steps fused Euler steps, optionally batched over trajectories.

    curr_x / dyn_para: (dim, T) or (batch, dim, T).  Batched trajectories are
    flattened onto the matmul M dimension (filling the MXU) and split into
    tm-row tiles across a "parallel" grid axis.
    """
    squeeze = curr_x.ndim == 2
    if squeeze:
        curr_x = curr_x[None]
        dyn_para = dyn_para[None]
    batch, dim, tsz = curr_x.shape
    m = batch * dim
    x2d = curr_x.reshape(m, tsz)
    p2d = dyn_para.reshape(m, tsz)
    tm = _pick_tile(m, dim)
    # b replicated only to ONE tm-row tile (size independent of batch), one-time.
    b_tile = jnp.tile(b, (tm // dim, 1))
    out = _euler_pallas(curr_t, x2d, p2d, W.astype(jnp.bfloat16), b_tile,
                        n_steps=n_steps, delta_t=delta_t, tm=tm)
    out = out.reshape(batch, dim, tsz)
    return out[0] if squeeze else out


# ----------------------------------------------------------------------------
# Pure-JAX references mirroring the PyTorch semantics (same bf16-matmul f).
# ----------------------------------------------------------------------------
def _f_ref(x, t, p, W_bf16, b):
    k = jnp.tanh(jnp.dot(x.astype(jnp.bfloat16), W_bf16,
                         preferred_element_type=jnp.float32) + t * b + p)
    return tuple(k[i] for i in range(k.shape[0]))      # tuple of per-row tensors


def _forward_ref(curr_t, curr_x, dyn_para, W_bf16, b, delta_t=DELTA_T):
    dim, tsz = curr_x.shape
    k_cat = jnp.concatenate(_f_ref(curr_x, curr_t, dyn_para, W_bf16, b))  # torch.cat
    k = jnp.reshape(k_cat, (dim, tsz))                                    # resize_(dim, T)
    return curr_x + delta_t * k


def _integrate_ref(curr_t, x, p, W_bf16, b, n_steps, delta_t=DELTA_T):
    # batched: x, p (B, dim, T); b (dim, T) broadcast over batch
    for s in range(n_steps):
        t = curr_t + delta_t * s
        k = jnp.tanh(jnp.dot(x.astype(jnp.bfloat16), W_bf16,
                             preferred_element_type=jnp.float32) + t * b + p)
        x = x + delta_t * k
    return x


# ----------------------------------------------------------------------------
if __name__ == "__main__":
    dim = 8            # self.dim
    tensor_size = 128  # self.tensor_size
    batch = 64         # batch*dim = 512 rows -> two 256-row "parallel" M-tiles
    n_steps = 8        # fused integration steps

    key = jax.random.PRNGKey(0)
    k_x, k_p, k_w, k_b, k_bx, k_bp = jax.random.split(key, 6)

    curr_t = jnp.float32(0.5)                                           # std_input[0]
    curr_x = jax.random.normal(k_x, (dim, tensor_size), jnp.float32)    # std_input[1]
    dyn_para = jax.random.normal(k_p, (dim, tensor_size), jnp.float32)  # std_input[2]

    # Deterministic synthetic parameters of the dynamics f.
    W = jax.random.normal(k_w, (tensor_size, tensor_size), jnp.float32) * 0.05
    b = jax.random.normal(k_b, (dim, tensor_size), jnp.float32) * 0.1
    W_bf16 = W.astype(jnp.bfloat16)

    # --- 1) single-step forward: exact module semantics -----------------------
    out = jax.block_until_ready(runge_kutta_forward(curr_t, curr_x, dyn_para, W, b))
    ref = _forward_ref(curr_t, curr_x, dyn_para, W_bf16, b)
    assert out.shape == (dim, tensor_size)
    assert jnp.allclose(out, ref, atol=1e-4, rtol=1e-4), "single-step mismatch"

    # --- 2) fused multi-step, batched trajectories (perf path) ----------------
    bx = jax.random.normal(k_bx, (batch, dim, tensor_size), jnp.float32)
    bp = jax.random.normal(k_bp, (batch, dim, tensor_size), jnp.float32)
    out_b = jax.block_until_ready(
        runge_kutta_integrate(curr_t, bx, bp, W, b, n_steps=n_steps))
    ref_b = _integrate_ref(curr_t, bx, bp, W_bf16, b, n_steps)
    assert out_b.shape == (batch, dim, tensor_size)
    assert jnp.allclose(out_b, ref_b, atol=2e-3, rtol=2e-3), "fused multi-step mismatch"

    print("KERNEL_OK")
</pallas_src>

<mosaic_0001>
module attributes {stable_mosaic.version = 11 : i64} {
  func.func @_fused_euler_kernel(%arg0: i32, %arg1: memref<1x1xf32, #tpu.memory_space<smem>>, %arg2: memref<8x128xf32, #tpu.memory_space<vmem>>, %arg3: memref<8x128xf32, #tpu.memory_space<vmem>>, %arg4: memref<128x128xbf16, #tpu.memory_space<vmem>>, %arg5: memref<8x128xf32, #tpu.memory_space<vmem>>, %arg6: memref<8x128xf32, #tpu.memory_space<vmem>>) attributes {dimension_semantics = [#tpu.dimension_semantics<parallel>], iteration_bounds = array<i64: 1>, scalar_prefetch = 0 : i64, scratch_operands = 0 : i64, tpu.core_type = #tpu.core_type<tc>, window_params = [{transform_indices = @transform_0, window_bounds = array<i64: 1, 1>}, {transform_indices = @transform_1, window_bounds = array<i64: 8, 128>}, {transform_indices = @transform_2, window_bounds = array<i64: 8, 128>}, {pipeline_mode = #tpu.pipeline_mode<synchronous>, transform_indices = @transform_3, window_bounds = array<i64: 128, 128>}, {pipeline_mode = #tpu.pipeline_mode<synchronous>, transform_indices = @transform_4, window_bounds = array<i64: 8, 128>}, {transform_indices = @transform_5, window_bounds = array<i64: 8, 128>}]} {
    %c0 = arith.constant 0 : index
    %c0_0 = arith.constant 0 : index
    %0 = memref.load %arg1[%c0, %c0_0] : memref<1x1xf32, #tpu.memory_space<smem>>
    %c0_1 = arith.constant 0 : index
    %c0_2 = arith.constant 0 : index
    %1 = vector.load %arg2[%c0_1, %c0_2] : memref<8x128xf32, #tpu.memory_space<vmem>>, vector<8x128xf32>
    %c0_3 = arith.constant 0 : index
    %c0_4 = arith.constant 0 : index
    %2 = vector.load %arg6[%c0_3, %c0_4] : memref<8x128xf32, #tpu.memory_space<vmem>>, vector<8x128xf32>
    tpu.vector_store %arg6[%c0_3, %c0_4], %1 {strides = array<i32>} : memref<8x128xf32, #tpu.memory_space<vmem>>, vector<8x128xf32>,
    %c0_i32 = arith.constant 0 : i32
    %3 = arith.sitofp %c0_i32 : i32 to f32
    %cst = arith.constant 1.000000e-01 : f32
    %4 = arith.mulf %cst, %3 : f32
    %5 = arith.addf %0, %4 : f32
    %c0_5 = arith.constant 0 : index
    %c0_6 = arith.constant 0 : index
    %6 = vector.load %arg6[%c0_5, %c0_6] : memref<8x128xf32, #tpu.memory_space<vmem>>, vector<8x128xf32>
    %c0_7 = arith.constant 0 : index
    %c0_8 = arith.constant 0 : index
    %7 = vector.load %arg5[%c0_7, %c0_8] : memref<8x128xf32, #tpu.memory_space<vmem>>, vector<8x128xf32>
    %8 = vector.broadcast %5 : f32 to vector<8x128xf32>
    %9 = arith.mulf %8, %7 : vector<8x128xf32>
    %c0_9 = arith.constant 0 : index
    %c0_10 = arith.constant 0 : index
    %10 = vector.load %arg3[%c0_9, %c0_10] : memref<8x128xf32, #tpu.memory_space<vmem>>, vector<8x128xf32>
    %11 = arith.addf %9, %10 : vector<8x128xf32>
    %12 = arith.truncf %6 : vector<8x128xf32> to vector<8x128xbf16>
    %c0_11 = arith.constant 0 : index
    %c0_12 = arith.constant 0 : index
    %13 = vector.load %arg4[%c0_11, %c0_12] : memref<128x128xbf16, #tpu.memory_space<vmem>>, vector<128x128xbf16>
    %cst_13 = arith.constant dense<0.000000e+00> : vector<8x128xf32>
    %14 = tpu.matmul %12, %13, %cst_13 {dimension_numbers = #tpu.dot_dimension_numbers<[1], [0], [0], [1], [0, 0, 1, 1], [], []>} : vector<8x128xbf16>, vector<128x128xbf16>, vector<8x128xf32> -> vector<8x128xf32>
    %15 = arith.addf %14, %11 : vector<8x128xf32>
    %16 = math.tanh %15 : vector<8x128xf32>
    %cst_14 = arith.constant 1.000000e-01 : f32
    %17 = vector.broadcast %cst_14 : f32 to vector<8x128xf32>
    %18 = arith.mulf %17, %16 : vector<8x128xf32>
    %19 = arith.addf %6, %18 : vector<8x128xf32>
    %c0_15 = arith.constant 0 : index
    %c0_16 = arith.constant 0 : index
    %20 = vector.load %arg6[%c0_15, %c0_16] : memref<8x128xf32, #tpu.memory_space<vmem>>, vector<8x128xf32>
    tpu.vector_store %arg6[%c0_15, %c0_16], %19 {strides = array<i32>} : memref<8x128xf32, #tpu.memory_space<vmem>>, vector<8x128xf32>,
    %c1_i32 = arith.constant 1 : i32
    return
  }
  func.func @transform_0(%arg0: i32) -> (i32, i32) {
    %c0_i32 = arith.constant 0 : i32
    %c0_i32_0 = arith.constant 0 : i32
    %c0_i32_1 = arith.constant 0 : i32
    return %c0_i32, %c0_i32_0 : i32, i32
  }
  func.func @transform_1(%arg0: i32) -> (i32, i32) {
    %c0_i32 = arith.constant 0 : i32
    %c0_i32_0 = arith.constant 0 : i32
    return %arg0, %c0_i32 : i32, i32
  }
  func.func @transform_2(%arg0: i32) -> (i32, i32) {
    %c0_i32 = arith.constant 0 : i32
    %c0_i32_0 = arith.constant 0 : i32
    return %arg0, %c0_i32 : i32, i32
  }
  func.func @transform_3(%arg0: i32) -> (i32, i32) {
    %c0_i32 = arith.constant 0 : i32
    %c0_i32_0 = arith.constant 0 : i32
    %c0_i32_1 = arith.constant 0 : i32
    return %c0_i32, %c0_i32_0 : i32, i32
  }
  func.func @transform_4(%arg0: i32) -> (i32, i32) {
    %c0_i32 = arith.constant 0 : i32
    %c0_i32_0 = arith.constant 0 : i32
    %c0_i32_1 = arith.constant 0 : i32
    return %c0_i32, %c0_i32_0 : i32, i32
  }
  func.func @transform_5(%arg0: i32) -> (i32, i32) {
    %c0_i32 = arith.constant 0 : i32
    %c0_i32_0 = arith.constant 0 : i32
    return %arg0, %c0_i32 : i32, i32
  }
}

</mosaic_0001>

<bundles_post_ra>
// kernel: tpu_custom_call.1
= control target key start
LH: loop header
LB: loop body
LE: loop exit
PB: predicated region body
PF: predicated region fallthrough
CT: control target
= control target key end

     0   :  { %11 = vsyncpa [#allocation4], 0  ;;  %s436_s0 = inlined_call_operand.<no memory space> [shape: f32[1,1], index: 0, kind: input, shape index: {}]   ;;  %s437_s1 = inlined_call_operand.hbm [shape: f32[8,128], index: 1, kind: input, shape index: {}]   ;;  %s438_s2 = inlined_call_operand.hbm [shape: f32[8,128], index: 2, kind: input, shape index: {}]   ;;  %s439_s3 = inlined_call_operand.hbm [shape: bf16[128,128], index: 3, kind: input, shape index: {}]   ;;  %s440_s4 = inlined_call_operand.vmem [shape: f32[8,128], index: 4, kind: input, shape index: {}]   ;;  %s441_s5 = inlined_call_operand.hbm [shape: f32[8,128], index: 5, kind: output, shape index: {}]  }
   0x1   :  { %12 = vsyncpa [#allocation7], 0 }
   0x2   :  { %13 = vsyncpa [#allocation5], 0  ;;  %s344_s18 = smov [#allocation6]   ;;  %s345_s20 = smov [#allocation3]  }
   0x3   :  { %s32_s19 = sshll.u32 %s344_s18, 4  ;;  %s22_s21 = sshll.u32 %s345_s20, 4  ;;  %s33_s19 = int_to_ptr.vmem [resolvable:$true] %s32_s19  ;;  %s23_s21 = int_to_ptr.vmem [resolvable:$true] %s22_s21 }
   0x4   :  { %s250_s24 = scalar_lea.hbm %s438_s2, 128 }
   0x5   :  { %p251_p0 = scmp.ne.s32.totalorder %s438_s2, %s250_s24  ;;  %p254_p1 = scmp.lt.u32.totalorder %s250_s24, %s438_s2 }
   0x7   :  { %p256_p2 = pnand %p254_p1, %p251_p0 }
   0x9   :  { %259 = shalt.err (!%p256_p2)
}
   0xa   :  { %s260_s29 = scalar_lea.vmem %s33_s19, 128  ;;  %p265_p4 = scmp.lt.s32.totalorder %s33_s19, %s33_s19 }
   0xb   :  { %p261_p3 = scmp.ne.s32.totalorder %s33_s19, %s260_s29  ;;  %p266_p5 = scmp.lt.s32.totalorder %s260_s29, %s260_s29 }
   0xd   :  { %p267_p6 = por %p266_p5, %p265_p4 }
   0xf   :  { %p268_p7 = pnand %p267_p6, %p261_p3 }
  0x11   :  { %271 = shalt.err (!%p268_p7)
}
  0x12   :  { %35 = dma.hbm_to_vmem [thread:$0]  %s438_s2, 128, %s33_s19, [#allocation7]  }
  0x13   :  { %s272_s9 = scalar_lea.hbm %s437_s1, 128 }
  0x14   :  { %p273_p8 = scmp.ne.s32.totalorder %s437_s1, %s272_s9  ;;  %p276_p9 = scmp.lt.u32.totalorder %s272_s9, %s437_s1 }
  0x16   :  { %p278_p10 = pnand %p276_p9, %p273_p8 }
  0x18   :  { %281 = shalt.err (!%p278_p10)
}
  0x19   :  { %s282_s14 = scalar_lea.vmem %s23_s21, 128  ;;  %p287_p12 = scmp.lt.s32.totalorder %s23_s21, %s23_s21 }
  0x1a   :  { %p283_p11 = scmp.ne.s32.totalorder %s23_s21, %s282_s14  ;;  %p288_p13 = scmp.lt.s32.totalorder %s282_s14, %s282_s14 }
  0x1c   :  { %p289_p0 = por %p288_p13, %p287_p12 }
  0x1e   :  { %p290_p1 = pnand %p289_p0, %p283_p11 }
  0x20   :  { %293 = shalt.err (!%p290_p1)
}
  0x21   :  { %25 = dma.hbm_to_vmem [thread:$0]  %s437_s1, 128, %s23_s21, [#allocation4]  }
  0x22   :  { %s346_s16 = smov [#allocation8]   ;;  %s294_s20 = scalar_lea.hbm %s439_s3, 1024 }
  0x23   :  { %s41_s17 = sshll.u32 %s346_s16, 4  ;;  %p295_p2 = scmp.ne.s32.totalorder %s439_s3, %s294_s20  ;;  %s42_s17 = int_to_ptr.vmem [resolvable:$true] %s41_s17 }
  0x24   :  { %p298_p3 = scmp.lt.u32.totalorder %s294_s20, %s439_s3 }
  0x26   :  { %p300_p4 = pnand %p298_p3, %p295_p2 }
  0x28   :  { %303 = shalt.err (!%p300_p4)
}
  0x29   :  { %s304_s26 = scalar_lea.vmem %s42_s17, 1024  ;;  %p309_p6 = scmp.lt.s32.totalorder %s42_s17, %s42_s17 }
  0x2a   :  { %p305_p5 = scmp.ne.s32.totalorder %s42_s17, %s304_s26  ;;  %p310_p7 = scmp.lt.s32.totalorder %s304_s26, %s304_s26 }
  0x2c   :  { %p311_p8 = por %p310_p7, %p309_p6 }
  0x2e   :  { %p312_p9 = pnand %p311_p8, %p305_p5 }
  0x30   :  { %315 = shalt.err (!%p312_p9)
}
  0x31   :  { %s347_s1 = smov 64   ;;  %s348_s21 = smov 4  }
  0x32   :  { %47 = dma.hbm_to_vmem [thread:$0]  %s439_s3, 1024, %s42_s17, [#allocation7], %s347_s1, %s347_s1, %s348_s21  }
  0x33   :  { %338 = dma.done.wait [#allocation4], 128  }
  0x34   :  { %339 = vsyncadd [#allocation4], 4294967168 }
  0x35   :  { %340 = dma.done.wait [#allocation7], 1152  }
  0x36   :  { %341 = vsyncadd [#allocation7], 4294966144  ;;  %v349_v0 = vmov 0.0   ;;  %vm350_vm0 = vmmov 0   ;;  %v240_v1 = vld [vmem:[#allocation8] sm:$0xff]   ;;  %v241_v2 = vld [vmem:[#allocation8 + $0x8] sm:$0xff]   ;;  %v66_v12 = vstv %s436_s0 }
  0x37   :  { %212 = vmatprep.subr.bf16.mxu0 %v349_v0  ;;  %228 = vmatprep.mubr.msk.bf16.mxu0 %vm350_vm0, %v349_v0  ;;  %v242_v3 = vld [vmem:[#allocation8 + $0x10] sm:$0xff]   ;;  %v243_v4 = vld [vmem:[#allocation8 + $0x18] sm:$0xff]   ;;  %v244_v5 = vld [vmem:[#allocation8 + $0x20] sm:$0xff]   ;;  %s351_s7 = smov [#allocation9]  }
  0x38   :  { %213 = vmatpush3.bf16.msra.mxu0 %v240_v1  ;;  %v245_v6 = vld [vmem:[#allocation8 + $0x28] sm:$0xff]   ;;  %v246_v7 = vld [vmem:[#allocation8 + $0x30] sm:$0xff]   ;;  %v247_v8 = vld [vmem:[#allocation8 + $0x38] sm:$0xff]   ;;  %s185_s8 = sshll.u32 %s351_s7, 4  ;;  %s186_s8 = int_to_ptr.vmem [resolvable:$true] %s185_s8 }
  0x39   :  { %214 = vmatprep.subr.bf16.mxu0 %v349_v0  ;;  %v61_v9 = vld [vmem:[#allocation3] sm:$0xff]  ;;  %v68_v14 = vld [vmem:[#allocation6] sm:$0xff]  ;;  %p321_p11 = scmp.lt.s32.totalorder %s186_s8, %s186_s8 }
  0x3a   :  { %v70_v10 = vpack.c.bf16 %v61_v9, %v61_v9  ;;  %v65_v11 = vld [vmem:[%s440_s4] sm:$0xff]  ;;  %s316_s4 = scalar_lea.vmem %s186_s8, 128 }
  0x3b   :  { %v67_v13 = vmul.f32 %v66_v12, %v65_v11  ;;  %p317_p10 = scmp.ne.s32.totalorder %s186_s8, %s316_s4  ;;  %p322_p12 = scmp.lt.s32.totalorder %s316_s4, %s316_s4 }
  0x3c   :  { %215 = vmatpush3.bf16.msra.mxu0 %v241_v2 }
  0x3d   :  { %216 = vmatprep.subr.bf16.mxu0 %v349_v0  ;;  %v69_v15 = vadd.f32 %v68_v14, %v67_v13  ;;  %p323_p13 = por %p322_p12, %p321_p11 }
  0x3f   :  { %p324_p0 = pnand %p323_p13, %p317_p10 }
  0x40   :  { %217 = vmatpush3.bf16.msra.mxu0 %v242_v3 }
  0x41   :  { %218 = vmatprep.subr.bf16.mxu0 %v349_v0 }
  0x44   :  { %219 = vmatpush3.bf16.msra.mxu0 %v243_v4 }
  0x45   :  { %220 = vmatprep.subr.bf16.mxu0 %v349_v0 }
  0x48   :  { %221 = vmatpush3.bf16.msra.mxu0 %v244_v5 }
  0x49   :  { %222 = vmatprep.subr.bf16.mxu0 %v349_v0 }
  0x4c   :  { %223 = vmatpush3.bf16.msra.mxu0 %v245_v6 }
  0x4d   :  { %224 = vmatprep.subr.bf16.mxu0 %v349_v0 }
  0x50   :  { %225 = vmatpush3.bf16.msra.mxu0 %v246_v7 }
  0x51   :  { %226 = vmatprep.subr.bf16.mxu0 %v349_v0 }
  0x54   :  { %227 = vmatpush3.bf16.msra.mxu0 %v247_v8 }
  0x57   :  { %229 = vmatmul.mubr.bf16.vlgmr.msra.gmra.mrb[0].mxu0 %v70_v10 }
 0x12a   :  { %v169_v16 = vpop.f32.mrb[0].mxu0 }
 0x12b   :  { %v170_v17 = vadd.f32 %v169_v16, %v69_v15  ;;  %v230_v18 = vpop.f32.mrb[1].mxu0 }
 0x12c   :  { %v172_v19 = vpop.f32.mrb[2].mxu0 }
 0x12d   :  { %248 = vtanh.f32 %v170_v17  ;;  %v231_v20 = vpop.f32.mrb[3].mxu0 }
 0x137   :  { %v249_v21 = vpop.eup %248 }
 0x138   :  { %v176_v22 = vmul.f32 0.1, %v249_v21 }
 0x13a   :  { %v177_v23 = vadd.f32 %v176_v22, %v61_v9 }
 0x13c   :  { %178 = vst [vmem:[#allocation9] sm:$0xff] %v177_v23 }
 0x13d   :  { %327 = shalt.err (!%p324_p0)
}
 0x13e   :  { %s328_s10 = scalar_lea.hbm %s441_s5, 128 }
 0x13f   :  { %p329_p1 = scmp.ne.s32.totalorder %s441_s5, %s328_s10  ;;  %p332_p2 = scmp.lt.u32.totalorder %s328_s10, %s441_s5 }
 0x141   :  { %p334_p3 = pnand %p332_p2, %p329_p1 }
 0x143   :  { %337 = shalt.err (!%p334_p3)
}
 0x144   :  { %188 = dma.vmem_to_hbm [thread:$0]  %s186_s8, 128, %s441_s5, [#allocation5]  }
 0x145   :  { %342 = dma.done.wait [#allocation5], 128  }
 0x146   :  { %343 = vsyncadd [#allocation5], 4294967168 }
 0x147   :  { %192 = vsyncpa [#allocation4], 1 }
 0x148   :  { %193 = vsyncpa [#allocation7], 1 }
 0x149   :  { %194 = vsyncpa [#allocation5], 1 }

</bundles_post_ra>
